<compile_context>
chip_gen: v6e
topology: v6e:2x2x1
jax: 0.10.0
libtpu: 0.0.40
codegen_flags: <defaults>
</compile_context>

<pallas_src>
import functools

import jax
import jax.numpy as jnp
from jax import lax
from jax.experimental import pallas as pl
from jax.experimental.pallas import tpu as pltpu

BN_EPS = 1e-5  # torch.nn.BatchNorm2d default; affine init gamma=1, beta=0

_TARGET_BLOCK_BYTES = 2 * 1024 * 1024   # ~2 MiB input block per grid step
_RESIDENT_BUDGET = 20 * 1024 * 1024     # conv slab + pipeline buffers budget
_VMEM_LIMIT = 32 * 1024 * 1024          # explicit scoped-VMEM limit (all gens)


def _fused_kernel(w_ref, x_ref, o_ref, conv_ref, sum_ref, sq_ref,
                  *, C, TB, inv_count, resident):
    # w_ref:    (C,)                f32 SMEM  (conv weights, scalar reads)
    # x_ref:    (TB, C, Rpad, 128)  f32 VMEM  (batch tile, all channels)
    # o_ref:    (TB, Rpad, 128)     f32 VMEM  (batch tile of output)
    # conv_ref: (N, Rpad, 128)      f32 VMEM scratch (resident conv) or dummy
    # sum_ref:  (Rpad, 128)         f32 VMEM scratch (running sum partials)
    # sq_ref:   (Rpad, 128)         f32 VMEM scratch (running sum-of-squares)
    phase = pl.program_id(0)   # 0 = statistics pass, 1 = normalize + epilogue
    t = pl.program_id(1)       # batch-tile index

    def compute_conv():
        # 1x1 conv (no bias) as a VPU weighted sum over channels: C FMAs/lane.
        acc = w_ref[0] * x_ref[:, 0, :, :]
        for c in range(1, C):
            acc = acc + w_ref[c] * x_ref[:, c, :, :]
        return acc                                     # (TB, Rpad, 128) f32

    @pl.when((phase == 0) & (t == 0))
    def _():
        sum_ref[...] = jnp.zeros_like(sum_ref)
        sq_ref[...] = jnp.zeros_like(sq_ref)

    @pl.when(phase == 0)
    def _():
        conv = compute_conv()
        if resident:
            start = pl.multiple_of(t * TB, TB)
            conv_ref[pl.ds(start, TB)] = conv          # stash for phase 1
        # Pure-VPU partial accumulation (reduce only over the batch-tile axis;
        # cross-sublane/lane reduction deferred to phase 1).
        sum_ref[...] += jnp.sum(conv, axis=0)
        sq_ref[...] += jnp.sum(conv * conv, axis=0)

    @pl.when(phase == 1)
    def _():
        if resident:
            start = pl.multiple_of(t * TB, TB)
            conv = conv_ref[pl.ds(start, TB)]          # no x re-read from HBM
        else:
            # TODO(synk): non-resident fallback could instead write raw conv to
            # the output in phase 0 and alias it back via input_output_aliases
            # (reads 1 channel instead of C in phase 1).
            conv = compute_conv()
        # Scalar finalize; runs once per batch tile (few steps after tiling),
        # off the DMA critical path.
        s = jnp.sum(sum_ref[...], axis=0, keepdims=True)       # (1, 128)
        s = jnp.sum(s, axis=1, keepdims=True)                  # (1, 1)
        ss = jnp.sum(sq_ref[...], axis=0, keepdims=True)
        ss = jnp.sum(ss, axis=1, keepdims=True)
        mean = s * inv_count
        var = jnp.maximum(ss * inv_count - mean * mean, 0.0)   # biased, >= 0
        a = lax.rsqrt(var + BN_EPS)                            # gamma = 1
        b = 3.0 - mean * a                                     # beta = 0, +3
        # clamp(bn + 3, 0, 6) * 3 / 6  ==  clip(conv*a + b, 0, 6) * 0.5
        o_ref[...] = jnp.clip(conv * a + b, 0.0, 6.0) * 0.5


def model_forward(x, conv_w):
    """x: (N, 3, H, W) float32, conv_w: (1, 3, 1, 1) float32 -> (N, 1, H, W)."""
    N, C, H, W = x.shape
    HW = H * W
    # TODO(synk): mask the lane tail when H*W is not a multiple of 128.
    assert HW % 128 == 0, "H*W must be a multiple of 128 for this kernel"
    R = HW // 128
    Rpad = ((R + 7) // 8) * 8          # sublane-full tiles -> unmasked stores

    # Free contiguous reshape; zero-pad the flattened spatial dim if needed
    # (zeros contribute nothing to sum/sumsq; true count used below).
    x3 = x.reshape(N, C, HW)
    if Rpad != R:
        x3 = jnp.pad(x3, ((0, 0), (0, 0), (0, Rpad * 128 - HW)))
    x4 = x3.reshape(N, C, Rpad, 128)
    w1 = conv_w.reshape(C).astype(jnp.float32)
    inv_count = 1.0 / float(N * HW)

    # Batch tiling: largest divisor of N whose input block is <= ~2 MiB.
    bytes_per_img_in = C * Rpad * 128 * 4
    TB = 1
    for d in range(1, N + 1):
        if N % d == 0 and d * bytes_per_img_in <= _TARGET_BLOCK_BYTES:
            TB = d
    NB = N // TB

    # Resident-conv decision (keeps phase 1 from re-reading x from HBM).
    x_blk = TB * bytes_per_img_in
    o_blk = TB * Rpad * 128 * 4
    conv_bytes = N * Rpad * 128 * 4
    stats_bytes = 2 * Rpad * 128 * 4
    resident = (conv_bytes + 2 * x_blk + 2 * o_blk + stats_bytes) <= _RESIDENT_BUDGET

    if resident:
        conv_scratch = pltpu.VMEM((N, Rpad, 128), jnp.float32)
        x_index_map = lambda p, t: (t * (1 - p), 0, 0, 0)   # pin x in phase 1
    else:
        conv_scratch = pltpu.VMEM((8, 128), jnp.float32)    # unused dummy
        x_index_map = lambda p, t: (t, 0, 0, 0)

    kernel = functools.partial(_fused_kernel, C=C, TB=TB,
                               inv_count=inv_count, resident=resident)

    out3 = pl.pallas_call(
        kernel,
        out_shape=jax.ShapeDtypeStruct((N, Rpad, 128), jnp.float32),
        grid_spec=pltpu.PrefetchScalarGridSpec(
            num_scalar_prefetch=0,
            grid=(2, NB),  # (phase, batch tile)
            in_specs=[
                pl.BlockSpec(memory_space=pltpu.MemorySpace.SMEM),   # weights
                pl.BlockSpec((TB, C, Rpad, 128), x_index_map),       # images
            ],
            # Phase 0 never writes; pin the output block at 0 there so no
            # writeback happens until phase-1 t=0 fills it.
            out_specs=pl.BlockSpec((TB, Rpad, 128), lambda p, t: (t * p, 0, 0)),
            scratch_shapes=[
                conv_scratch,                            # resident conv slab
                pltpu.VMEM((Rpad, 128), jnp.float32),    # running sum partials
                pltpu.VMEM((Rpad, 128), jnp.float32),    # running sum of squares
            ],
        ),
        compiler_params=pltpu.CompilerParams(
            dimension_semantics=("arbitrary", "arbitrary"),
            vmem_limit_bytes=_VMEM_LIMIT),
    )(w1, x4)

    # (N, Rpad, 128) -> drop spatial padding -> (N, 1, H, W) (NCHW order kept).
    out = out3.reshape(N, Rpad * 128)[:, :HW]
    return out.reshape(N, 1, H, W)


def _reference(x, conv_w):
    # Pure-JAX reference (train-mode BatchNorm, gamma=1, beta=0).
    conv = jnp.einsum("nchw,oc->nohw", x, conv_w.reshape(1, -1))
    mean = jnp.mean(conv)
    var = jnp.mean((conv - mean) ** 2)
    xn = (conv - mean) / jnp.sqrt(var + BN_EPS)
    return jnp.clip(xn + 3.0, 0.0, 6.0) * 3.0 / 6.0


if __name__ == "__main__":
    key = jax.random.PRNGKey(0)
    kx, kw = jax.random.split(key)

    # Small shapes consistent with the module (C_in = 3 is required).
    N, C, H, W = 2, 3, 16, 16
    x = jax.random.normal(kx, (N, C, H, W), dtype=jnp.float32)
    # Deterministic conv weight (Conv2d(3, 1, 1, bias=False)).
    conv_w = jax.random.normal(kw, (1, C, 1, 1), dtype=jnp.float32) * 0.1

    out = model_forward(x, conv_w)
    jax.block_until_ready(out)

    ref = _reference(x, conv_w)
    assert out.shape == (N, 1, H, W)
    assert jnp.allclose(out, ref, atol=1e-5, rtol=1e-4), float(
        jnp.max(jnp.abs(out - ref)))

    print("KERNEL_OK")
</pallas_src>

<mosaic_0001>
module attributes {stable_mosaic.version = 11 : i64} {
  func.func @_fused_kernel(%arg0: i32, %arg1: i32, %arg2: memref<3xf32, #tpu.memory_space<smem>>, %arg3: memref<2x3x8x128xf32, #tpu.memory_space<vmem>>, %arg4: memref<2x8x128xf32, #tpu.memory_space<vmem>>, %arg5: memref<2x8x128xf32, #tpu.memory_space<vmem>>, %arg6: memref<8x128xf32, #tpu.memory_space<vmem>>, %arg7: memref<8x128xf32, #tpu.memory_space<vmem>>) attributes {dimension_semantics = [#tpu.dimension_semantics<arbitrary>, #tpu.dimension_semantics<arbitrary>], iteration_bounds = array<i64: 2, 1>, scalar_prefetch = 0 : i64, scratch_operands = 3 : i64, tpu.core_type = #tpu.core_type<tc>, window_params = [{transform_indices = @transform_0, window_bounds = array<i64: 3>}, {transform_indices = @transform_1, window_bounds = array<i64: 2, 3, 8, 128>}, {transform_indices = @transform_2, window_bounds = array<i64: 2, 8, 128>}]} {
    %c0_i32 = arith.constant 0 : i32
    %0 = arith.cmpi eq, %arg0, %c0_i32 : i32
    %c0_i32_0 = arith.constant 0 : i32
    %1 = arith.cmpi eq, %arg1, %c0_i32_0 : i32
    %2 = arith.andi %0, %1 : i1
    %3 = arith.extui %2 : i1 to i32
    %c0_i32_1 = arith.constant 0 : i32
    %4 = arith.cmpi ne, %3, %c0_i32_1 : i32
    scf.if %4 {
      %cst = arith.constant 0.000000e+00 : f32
      %11 = vector.broadcast %cst : f32 to vector<8x128xf32>
      %c0 = arith.constant 0 : index
      %c0_5 = arith.constant 0 : index
      %12 = vector.load %arg6[%c0, %c0_5] : memref<8x128xf32, #tpu.memory_space<vmem>>, vector<8x128xf32>
      tpu.vector_store %arg6[%c0, %c0_5], %11 {strides = array<i32>} : memref<8x128xf32, #tpu.memory_space<vmem>>, vector<8x128xf32>,
      %cst_6 = arith.constant 0.000000e+00 : f32
      %13 = vector.broadcast %cst_6 : f32 to vector<8x128xf32>
      %c0_7 = arith.constant 0 : index
      %c0_8 = arith.constant 0 : index
      %14 = vector.load %arg7[%c0_7, %c0_8] : memref<8x128xf32, #tpu.memory_space<vmem>>, vector<8x128xf32>
      tpu.vector_store %arg7[%c0_7, %c0_8], %13 {strides = array<i32>} : memref<8x128xf32, #tpu.memory_space<vmem>>, vector<8x128xf32>,
    } else {
    }
    %c0_i32_2 = arith.constant 0 : i32
    %5 = arith.cmpi eq, %arg0, %c0_i32_2 : i32
    %6 = arith.extui %5 : i1 to i32
    %c0_i32_3 = arith.constant 0 : i32
    %7 = arith.cmpi ne, %6, %c0_i32_3 : i32
    scf.if %7 {
      %c0 = arith.constant 0 : index
      %11 = memref.load %arg2[%c0] : memref<3xf32, #tpu.memory_space<smem>>
      %c0_5 = arith.constant 0 : index
      %c0_6 = arith.constant 0 : index
      %c0_7 = arith.constant 0 : index
      %c0_8 = arith.constant 0 : index
      %12 = vector.load %arg3[%c0_5, %c0_6, %c0_7, %c0_8] : memref<2x3x8x128xf32, #tpu.memory_space<vmem>>, vector<2x1x8x128xf32>
      %13 = vector.shape_cast %12 : vector<2x1x8x128xf32> to vector<2x8x128xf32>
      %14 = vector.broadcast %11 : f32 to vector<2x8x128xf32>
      %15 = arith.mulf %14, %13 : vector<2x8x128xf32>
      %c1 = arith.constant 1 : index
      %16 = memref.load %arg2[%c1] : memref<3xf32, #tpu.memory_space<smem>>
      %c0_9 = arith.constant 0 : index
      %c1_10 = arith.constant 1 : index
      %c0_11 = arith.constant 0 : index
      %c0_12 = arith.constant 0 : index
      %17 = vector.load %arg3[%c0_9, %c1_10, %c0_11, %c0_12] : memref<2x3x8x128xf32, #tpu.memory_space<vmem>>, vector<2x1x8x128xf32>
      %18 = vector.shape_cast %17 : vector<2x1x8x128xf32> to vector<2x8x128xf32>
      %19 = vector.broadcast %16 : f32 to vector<2x8x128xf32>
      %20 = arith.mulf %19, %18 : vector<2x8x128xf32>
      %21 = arith.addf %15, %20 : vector<2x8x128xf32>
      %c2 = arith.constant 2 : index
      %22 = memref.load %arg2[%c2] : memref<3xf32, #tpu.memory_space<smem>>
      %c0_13 = arith.constant 0 : index
      %c2_14 = arith.constant 2 : index
      %c0_15 = arith.constant 0 : index
      %c0_16 = arith.constant 0 : index
      %23 = vector.load %arg3[%c0_13, %c2_14, %c0_15, %c0_16] : memref<2x3x8x128xf32, #tpu.memory_space<vmem>>, vector<2x1x8x128xf32>
      %24 = vector.shape_cast %23 : vector<2x1x8x128xf32> to vector<2x8x128xf32>
      %25 = vector.broadcast %22 : f32 to vector<2x8x128xf32>
      %26 = arith.mulf %25, %24 : vector<2x8x128xf32>
      %27 = arith.addf %21, %26 : vector<2x8x128xf32>
      %c2_i32 = arith.constant 2 : i32
      %28 = arith.muli %arg1, %c2_i32 : i32
      %29 = tpu.assume_multiple %28, 2 : i32
      %30 = arith.index_cast %29 : i32 to index
      %c0_17 = arith.constant 0 : index
      %c0_18 = arith.constant 0 : index
      %31 = vector.load %arg5[%30, %c0_17, %c0_18] : memref<2x8x128xf32, #tpu.memory_space<vmem>>, vector<2x8x128xf32>
      tpu.vector_store %arg5[%30, %c0_17, %c0_18], %27 {strides = array<i32>} : memref<2x8x128xf32, #tpu.memory_space<vmem>>, vector<2x8x128xf32>,
      %c0_19 = arith.constant 0 : index
      %c0_20 = arith.constant 0 : index
      %32 = vector.load %arg6[%c0_19, %c0_20] : memref<8x128xf32, #tpu.memory_space<vmem>>, vector<8x128xf32>
      %cst = arith.constant dense<0.000000e+00> : vector<8x128xf32>
      %33 = vector.multi_reduction <add>, %27, %cst [0] : vector<2x8x128xf32> to vector<8x128xf32>
      %34 = arith.addf %32, %33 : vector<8x128xf32>
      %c0_21 = arith.constant 0 : index
      %c0_22 = arith.constant 0 : index
      %35 = vector.load %arg6[%c0_21, %c0_22] : memref<8x128xf32, #tpu.memory_space<vmem>>, vector<8x128xf32>
      tpu.vector_store %arg6[%c0_21, %c0_22], %34 {strides = array<i32>} : memref<8x128xf32, #tpu.memory_space<vmem>>, vector<8x128xf32>,
      %c0_23 = arith.constant 0 : index
      %c0_24 = arith.constant 0 : index
      %36 = vector.load %arg7[%c0_23, %c0_24] : memref<8x128xf32, #tpu.memory_space<vmem>>, vector<8x128xf32>
      %37 = arith.mulf %27, %27 : vector<2x8x128xf32>
      %cst_25 = arith.constant dense<0.000000e+00> : vector<8x128xf32>
      %38 = vector.multi_reduction <add>, %37, %cst_25 [0] : vector<2x8x128xf32> to vector<8x128xf32>
      %39 = arith.addf %36, %38 : vector<8x128xf32>
      %c0_26 = arith.constant 0 : index
      %c0_27 = arith.constant 0 : index
      %40 = vector.load %arg7[%c0_26, %c0_27] : memref<8x128xf32, #tpu.memory_space<vmem>>, vector<8x128xf32>
      tpu.vector_store %arg7[%c0_26, %c0_27], %39 {strides = array<i32>} : memref<8x128xf32, #tpu.memory_space<vmem>>, vector<8x128xf32>,
    } else {
    }
    %c1_i32 = arith.constant 1 : i32
    %8 = arith.cmpi eq, %arg0, %c1_i32 : i32
    %9 = arith.extui %8 : i1 to i32
    %c0_i32_4 = arith.constant 0 : i32
    %10 = arith.cmpi ne, %9, %c0_i32_4 : i32
    scf.if %10 {
      %c2_i32 = arith.constant 2 : i32
      %11 = arith.muli %arg1, %c2_i32 : i32
      %12 = tpu.assume_multiple %11, 2 : i32
      %13 = arith.index_cast %12 : i32 to index
      %c0 = arith.constant 0 : index
      %c0_5 = arith.constant 0 : index
      %14 = vector.load %arg5[%13, %c0, %c0_5] : memref<2x8x128xf32, #tpu.memory_space<vmem>>, vector<2x8x128xf32>
      %c0_6 = arith.constant 0 : index
      %c0_7 = arith.constant 0 : index
      %15 = vector.load %arg6[%c0_6, %c0_7] : memref<8x128xf32, #tpu.memory_space<vmem>>, vector<8x128xf32>
      %cst = arith.constant dense<0.000000e+00> : vector<128xf32>
      %16 = vector.multi_reduction <add>, %15, %cst [0] : vector<8x128xf32> to vector<128xf32>
      %17 = vector.shape_cast %16 : vector<128xf32> to vector<1x128xf32>
      %cst_8 = arith.constant dense<0.000000e+00> : vector<1xf32>
      %18 = vector.multi_reduction <add>, %17, %cst_8 [1] : vector<1x128xf32> to vector<1xf32>
      %19 = vector.shape_cast %18 : vector<1xf32> to vector<1x1xf32>
      %c0_9 = arith.constant 0 : index
      %c0_10 = arith.constant 0 : index
      %20 = vector.load %arg7[%c0_9, %c0_10] : memref<8x128xf32, #tpu.memory_space<vmem>>, vector<8x128xf32>
      %cst_11 = arith.constant dense<0.000000e+00> : vector<128xf32>
      %21 = vector.multi_reduction <add>, %20, %cst_11 [0] : vector<8x128xf32> to vector<128xf32>
      %22 = vector.shape_cast %21 : vector<128xf32> to vector<1x128xf32>
      %cst_12 = arith.constant dense<0.000000e+00> : vector<1xf32>
      %23 = vector.multi_reduction <add>, %22, %cst_12 [1] : vector<1x128xf32> to vector<1xf32>
      %24 = vector.shape_cast %23 : vector<1xf32> to vector<1x1xf32>
      %cst_13 = arith.constant 0.001953125 : f32
      %25 = vector.broadcast %cst_13 : f32 to vector<1x1xf32>
      %26 = arith.mulf %19, %25 : vector<1x1xf32>
      %cst_14 = arith.constant 0.001953125 : f32
      %27 = vector.broadcast %cst_14 : f32 to vector<1x1xf32>
      %28 = arith.mulf %24, %27 : vector<1x1xf32>
      %29 = arith.mulf %26, %26 : vector<1x1xf32>
      %30 = arith.subf %28, %29 : vector<1x1xf32>
      %cst_15 = arith.constant 0.000000e+00 : f32
      %31 = vector.broadcast %cst_15 : f32 to vector<1x1xf32>
      %32 = arith.maximumf %30, %31 : vector<1x1xf32>
      %cst_16 = arith.constant 9.99999974E-6 : f32
      %33 = vector.broadcast %cst_16 : f32 to vector<1x1xf32>
      %34 = arith.addf %32, %33 : vector<1x1xf32>
      %35 = math.rsqrt %34 : vector<1x1xf32>
      %36 = arith.mulf %26, %35 : vector<1x1xf32>
      %cst_17 = arith.constant 3.000000e+00 : f32
      %37 = vector.broadcast %cst_17 : f32 to vector<1x1xf32>
      %38 = arith.subf %37, %36 : vector<1x1xf32>
      %39 = vector.shape_cast %35 : vector<1x1xf32> to vector<1x1x1xf32>
      %40 = vector.broadcast %39 : vector<1x1x1xf32> to vector<2x8x128xf32>
      %41 = arith.mulf %14, %40 : vector<2x8x128xf32>
      %42 = vector.shape_cast %38 : vector<1x1xf32> to vector<1x1x1xf32>
      %43 = vector.broadcast %42 : vector<1x1x1xf32> to vector<2x8x128xf32>
      %44 = arith.addf %41, %43 : vector<2x8x128xf32>
      %cst_18 = arith.constant 0.000000e+00 : f32
      %cst_19 = arith.constant 6.000000e+00 : f32
      %45 = vector.broadcast %cst_18 : f32 to vector<2x8x128xf32>
      %46 = arith.maximumf %45, %44 : vector<2x8x128xf32>
      %47 = vector.broadcast %cst_19 : f32 to vector<2x8x128xf32>
      %48 = arith.minimumf %47, %46 : vector<2x8x128xf32>
      %cst_20 = arith.constant 5.000000e-01 : f32
      %49 = vector.broadcast %cst_20 : f32 to vector<2x8x128xf32>
      %50 = arith.mulf %48, %49 : vector<2x8x128xf32>
      %c0_21 = arith.constant 0 : index
      %c0_22 = arith.constant 0 : index
      %c0_23 = arith.constant 0 : index
      %51 = vector.load %arg4[%c0_21, %c0_22, %c0_23] : memref<2x8x128xf32, #tpu.memory_space<vmem>>, vector<2x8x128xf32>
      tpu.vector_store %arg4[%c0_21, %c0_22, %c0_23], %50 {strides = array<i32>} : memref<2x8x128xf32, #tpu.memory_space<vmem>>, vector<2x8x128xf32>,
    } else {
    }
    return
  }
  func.func @transform_0(%arg0: i32, %arg1: i32) -> i32 {
    %c0_i32 = arith.constant 0 : i32
    %c0_i32_0 = arith.constant 0 : i32
    return %c0_i32 : i32
  }
  func.func @transform_1(%arg0: i32, %arg1: i32) -> (i32, i32, i32, i32) {
    %c1_i32 = arith.constant 1 : i32
    %0 = arith.subi %c1_i32, %arg0 : i32
    %1 = arith.muli %arg1, %0 : i32
    %c0_i32 = arith.constant 0 : i32
    %c0_i32_0 = arith.constant 0 : i32
    %c0_i32_1 = arith.constant 0 : i32
    %c0_i32_2 = arith.constant 0 : i32
    return %1, %c0_i32, %c0_i32_0, %c0_i32_1 : i32, i32, i32, i32
  }
  func.func @transform_2(%arg0: i32, %arg1: i32) -> (i32, i32, i32) {
    %0 = arith.muli %arg1, %arg0 : i32
    %c0_i32 = arith.constant 0 : i32
    %c0_i32_0 = arith.constant 0 : i32
    %c0_i32_1 = arith.constant 0 : i32
    return %0, %c0_i32, %c0_i32_0 : i32, i32, i32
  }
}

</mosaic_0001>

<bundles_post_ra>
// kernel: tpu_custom_call.1
= control target key start
LH: loop header
LB: loop body
LE: loop exit
PB: predicated region body
PF: predicated region fallthrough
CT: control target
= control target key end

     0   :  { %7 = vsyncpa [#allocation8], 0  ;;  %s711_s0 = inlined_call_operand.hbm [shape: f32[3], index: 0, kind: input, shape index: {}]   ;;  %s712_s1 = inlined_call_operand.hbm [shape: f32[2,3,8,128], index: 1, kind: input, shape index: {}]   ;;  %s713_s2 = inlined_call_operand.hbm [shape: f32[2,8,128], index: 2, kind: output, shape index: {}]  }
   0x1   :  { %8 = vsyncpa [#allocation6], 0 }
   0x2   :  { %10 = vsyncpa [#allocation6 + $0x1], 0 }
   0x3   :  { %11 = vsyncpa [#allocation7], 0 }
   0x4   :  { %13 = vsyncpa [#allocation7 + $0x1], 0  ;;  %s619_s9 = smov 0   ;;  %s621_s10 = smov 0  }
   0x5   :  { %s623_s11 = smov 0  }
   0x6 LB: > { %s410_s12 = sadd.s32 4294967295, %s594_s11   ;;  %s411_s13 = sadd.s32 4294967294, %s594_s11   ;;  %s594_s11 = sphi %s623_s11, %s19_s11   ;;  %s590_s10 = sphi %s621_s10, %s719_s10   ;;  %s586_s9 = sphi %s619_s9, %s718_s9  }
   0x7   : > { %s31_s14 = sadd.s32 1, %s590_s10  ;;  %p412_p0 = scmp.ge.s32.totalorder %s594_s11, 1 }
   0x8   : > { %p33_p1 = scmp.ge.s32.totalorder %s31_s14, 2  ;;  %p115_p2 = scmp.lt.s32.totalorder %s594_s11, 3 }
   0x9   : > { %p641_p3 = scmp.eq.s32.totalorder %s410_s12, 0  ;;  %p414_p5 = scmp.ge.s32.totalorder %s594_s11, 2 }
   0xa   : > { %s721_s14 = smov (%p33_p1, %s31_s14), 0  ;;  %p647_p4 = pnand %p412_p0, %p115_p2 }
   0xb   : > { %p458_p7 = scmp.lt.s32.totalorder %s594_s11, 2  ;;  %p459_p8 = scmp.eq.s32.totalorder %s594_s11, 0 }
   0xc   : > { %p445_p6 = pneg %p647_p4  ;;  %s596_s17 = smov [#allocation9]  }
   0xd   : > { %s151_s18 = sshll.u32 %s596_s17, 4  ;;  %p658_p10 = pnand %p459_p8, %p458_p7  ;;  %s152_s18 = int_to_ptr.vmem [resolvable:$true] %s151_s18 }
   0xe   : > { %p446_p9 = pnand %p641_p3, %p445_p6  ;;  %s597_s20 = smov [#allocation5]  }
   0xf   : > { %p512_p11 = pneg %p658_p10  ;;  %s521_s23 = scalar_lea.vmem %s152_s18, 768 }
  0x10   : > { %448 = dma.hbm_to_smem (!%p446_p9), %s711_s0, 16, %s597_s20, [#allocation8]  }
  0x11   : > { %p522_p12 = scmp.ne.s32.totalorder %s152_s18, %s521_s23  ;;  %s528_s24 = scalar_lea.vmem %s152_s18, 1536 }
  0x12   : > { %p529_p1 = scmp.lt.s32.totalorder %s152_s18, %s152_s18  ;;  %p530_p2 = scmp.lt.s32.totalorder %s528_s24, %s521_s23 }
  0x13   : > { %p524_p13 = pnand %p522_p12, %p512_p11 }
  0x14   : > { %p531_p6 = por %p530_p2, %p529_p1 }
  0x15   : > { %p525_p0 = pneg %p524_p13 }
  0x17   : > { %p532_p7 = pnand %p531_p6, %p525_p0 }
  0x19   : > { %535 = shalt.err (!%p532_p7)
}
  0x1a   : > { %s598_s25 = smov 128   ;;  %s599_s26 = smov 8  }
  0x1b   : > { %452 = dma.hbm_to_vmem [thread:$0]  (!%p658_p10), %s712_s1, 768, %s152_s18, [#allocation6], %s598_s25, %s598_s25, %s599_s26  }
  0x1c   : > { %163 = sbr.rel (%p647_p4) target bundleno = 278 (0x116), region = 28 }
  0x21   : > { %573 = dma.done.wait (%p641_p3), [#allocation8], 16  }
  0x22   : > { %575 = vsyncadd (%p641_p3), [#allocation8], 4294967280 }
  0x23   : > { %577 = dma.done.wait (%p641_p3), [#allocation6], 768  }
  0x24   : > { %579 = vsyncadd (%p641_p3), [#allocation6], 4294966528 }
  0x25   : > { %178 = sfence }
  0x26   : > { %p200_p8 = scmp.eq.s32.totalorder %s586_s9, 0 }
  0x27   : > { %v600_v0 = vmov (%p200_p8), 0.0  }
  0x28   : > { %205 = sbr.rel (!%p200_p8) target bundleno = 45 (0x2d), region = 40  ;;  %206 = vst [vmem:[#allocation3] sm:$0xff] (%p200_p8), %v600_v0  ;;  %207 = vst [vmem:[#allocation4] sm:$0xff] (%p200_p8), %v600_v0 }
  0x2d PF: > { %p420_p4 = scmp.ne.s32.totalorder %s586_s9, 0 }
  0x2e   : > { %s211_s29 = sld [smem:[#allocation5]] (!%p420_p4) }
  0x2f   : > { %210 = sbr.rel (%p420_p4) target bundleno = 67 (0x43), region = 44  ;;  %s421_s30 = sld [smem:[#allocation5 + $0x1]] (!%p420_p4) }
  0x30   : > { %s424_s3 = sld [smem:[#allocation5 + $0x2]] (!%p420_p4) }
  0x34   : > { %v212_v1 = vld [vmem:[#allocation9] sm:$0xff]  ;;  %v213_v2 = vld [vmem:[#allocation9 + $0x18] sm:$0xff]  ;;  %v422_v3 = vld [vmem:[#allocation9 + $0x8] sm:$0xff]  ;;  %v214_v5 = vstv %s211_s29 }
  0x35   : > { %v423_v4 = vld [vmem:[#allocation9 + $0x20] sm:$0xff]  ;;  %v425_v6 = vld [vmem:[#allocation9 + $0x10] sm:$0xff]  ;;  %v426_v7 = vld [vmem:[#allocation9 + $0x28] sm:$0xff]  ;;  %v215_v8 = vmul.f32 %v214_v5, %v212_v1  ;;  %v221_v9 = vstv %s421_s30  ;;  %v216_v10 = vmul.f32 %v214_v5, %v213_v2 }
  0x36   : > { %v222_v11 = vmul.f32 %v422_v3, %v221_v9  ;;  %v230_v12 = vstv %s424_s3  ;;  %v223_v13 = vmul.f32 %v423_v4, %v221_v9  ;;  %v240_v20 = vld [vmem:[#allocation3] sm:$0xff]  ;;  %v244_v24 = vld [vmem:[#allocation4] sm:$0xff] }
  0x37   : > { %v231_v14 = vmul.f32 %v425_v6, %v230_v12  ;;  %v232_v15 = vmul.f32 %v426_v7, %v230_v12 }
  0x38   : > { %v224_v16 = vadd.f32 %v222_v11, %v215_v8  ;;  %v225_v17 = vadd.f32 %v223_v13, %v216_v10 }
  0x3a   : > { %v233_v18 = vadd.f32 %v231_v14, %v224_v16  ;;  %v234_v19 = vadd.f32 %v232_v15, %v225_v17 }
  0x3c   : > { %238 = vst [vmem:[#allocation2] sm:$0xff] %v233_v18  ;;  %239 = vst [vmem:[#allocation2 + $0x8] sm:$0xff] %v234_v19  ;;  %v241_v21 = vadd.f32 %v234_v19, %v233_v18  ;;  %v245_v22 = vmul.f32 %v233_v18, %v233_v18  ;;  %v246_v23 = vmul.f32 %v234_v19, %v234_v19 }
  0x3e   : > { %v242_v25 = vadd.f32 %v241_v21, %v240_v20  ;;  %v247_v26 = vadd.f32 %v246_v23, %v245_v22 }
  0x40   : > { %243 = vst [vmem:[#allocation3] sm:$0xff] %v242_v25  ;;  %v248_v27 = vadd.f32 %v247_v26, %v244_v24 }
  0x42   : > { %249 = vst [vmem:[#allocation4] sm:$0xff] %v248_v27 }
  0x43 PF: > { %p427_p3 = scmp.ne.s32.totalorder %s586_s9, 1 }
  0x45   : > { %253 = sbr.rel (%p427_p3) target bundleno = 264 (0x108), region = 48 }
  0x4a   : > { %v259_v28 = vld [vmem:[#allocation3] sm:$0xff]  ;;  %v268_v29 = vld [vmem:[#allocation4] sm:$0xff]  ;;  %v257_v51 = vld [vmem:[#allocation2] sm:$0xff] }
  0x4b   : > { %v260_v30 = vrot.slane %v259_v28, 4  ;;  %v269_v31 = vrot.slane %v268_v29, 4  ;;  %v258_v52 = vld [vmem:[#allocation2 + $0x8] sm:$0xff] }
  0x4d   : > { %v261_v32 = vadd.f32 %v260_v30, %v259_v28  ;;  %v270_v33 = vadd.f32 %v269_v31, %v268_v29 }
  0x4f   : > { %v262_v34 = vrot.slane %v261_v32, 2  ;;  %v271_v35 = vrot.slane %v270_v33, 2 }
  0x51   : > { %v263_v36 = vadd.f32 %v262_v34, %v261_v32  ;;  %v272_v37 = vadd.f32 %v271_v35, %v270_v33 }
  0x53   : > { %v264_v38 = vrot.slane %v263_v36, 1  ;;  %v273_v39 = vrot.slane %v272_v37, 1 }
  0x55   : > { %v265_v40 = vadd.f32 %v264_v38, %v263_v36  ;;  %v274_v41 = vadd.f32 %v273_v39, %v272_v37 }
  0x57   : > { %266 = vadd.xlane.f32.xlu0 %v265_v40 }
  0x5b   : > { %275 = vadd.xlane.f32.xlu0 %v274_v41 }
  0xe0   : > { %v267_v42 = vpop.xlane.xlu0 %266 }
  0xe1   : > { %v277_v43 = vmul.f32 0.001953125, %v267_v42 }
  0xe3   : > { %v279_v45 = vmul.f32 %v277_v43, %v277_v43 }
  0xe4   : > { %v276_v44 = vpop.xlane.xlu0 %275 }
  0xe5   : > { %v278_v46 = vmul.f32 0.001953125, %v276_v44 }
  0xe7   : > { %v280_v47 = vsub.f32 %v278_v46, %v279_v45 }
  0xe9   : > { %v281_v48 = vmax.f32 %v280_v47, 0.0 }
  0xeb   : > { %v282_v49 = vadd.f32 1e-05, %v281_v48 }
  0xed   : > { %497 = vrsqrt.f32 %v282_v49 }
  0xfa   : > { %v498_v50 = vpop.eup %497 }
  0xfb   : > { %v284_v53 = vmul.f32 %v498_v50, %v277_v43  ;;  %v286_v55 = vmul.f32 %v498_v50, %v257_v51  ;;  %v287_v56 = vmul.f32 %v498_v50, %v258_v52 }
  0xfd   : > { %v285_v54 = vsub.f32 3.0, %v284_v53 }
  0xff   : > { %v288_v57 = vadd.f32 %v286_v55, %v285_v54  ;;  %v289_v58 = vadd.f32 %v287_v56, %v285_v54 }
 0x101   : > { %v290_v59 = vmax.f32 %v288_v57, 0.0  ;;  %v291_v60 = vmax.f32 %v289_v58, 0.0 }
 0x103   : > { %v292_v61 = vmin.f32 %v290_v59, 6.0  ;;  %v293_v62 = vmin.f32 %v291_v60, 6.0 }
 0x105   : > { %v294_v63 = vmul.f32 0.5, %v292_v61  ;;  %v295_v0 = vmul.f32 0.5, %v293_v62 }
 0x107   : > { %296 = vst [vmem:[#allocation10] sm:$0xff] %v294_v63  ;;  %297 = vst [vmem:[#allocation10 + $0x8] sm:$0xff] %v295_v0 }
 0x108 PF: > { %p687_p9 = scmp.eq.s32.totalorder %s410_s12, 1  ;;  %s601_s5 = smov [#allocation10]  }
 0x109   : > { %s313_s6 = sshll.u32 %s601_s5, 4  ;;  %s314_s6 = int_to_ptr.vmem [resolvable:$true] %s313_s6 }
 0x10a   : > { %s536_s7 = scalar_lea.vmem %s314_s6, 256  ;;  %s542_s8 = scalar_lea.vmem %s314_s6, 512 }
 0x10b   : > { %p537_p10 = scmp.ne.s32.totalorder %s314_s6, %s536_s7  ;;  %p543_p13 = scmp.lt.s32.totalorder %s314_s6, %s314_s6 }
 0x10c   : > { %p544_p0 = scmp.lt.s32.totalorder %s542_s8, %s536_s7 }
 0x10d   : > { %p538_p11 = pnand %p537_p10, %p687_p9 }
 0x10e   : > { %p545_p1 = por %p544_p0, %p543_p13 }
 0x10f   : > { %p539_p12 = pneg %p538_p11 }
 0x111   : > { %p546_p2 = pnand %p545_p1, %p539_p12 }
 0x113   : > { %549 = shalt.err (!%p546_p2)
}
 0x114   : > { %s602_s9 = smov 128   ;;  %s603_s12 = smov 8  }
 0x115   : > { %442 = dma.vmem_to_hbm [thread:$0]  (%p687_p9), %s314_s6, 256, %s713_s2, [#allocation7], %s602_s9, %s602_s9, %s603_s12  }
 0x116 PF: > { %p464_p6 = scmp.eq.s32.totalorder %s411_s13, 1 }
 0x118   : > { %p454_p7 = pnand %p464_p6, %p414_p5 }
 0x11a   : > { %p455_p8 = pneg %p454_p7 }
 0x11c   : > { %581 = dma.done.wait (%p455_p8), [#allocation7], 256  }
 0x11d   : > { %583 = vsyncadd (%p455_p8), [#allocation7], 4294967040  ;;  %s19_s11 = sadd.s32 1, %s594_s11   ;;  %s718_s9 = smov %s590_s10 }
 0x11e   : > { %p16_p4 = scmp.ge.s32.totalorder %s19_s11, 4   ;;  %s719_s10 = smov %s721_s14 }
 0x120   :  { %18 = sbr.rel (!%p16_p4) target bundleno = 6 (0x6), region = 94 }
 0x125   :  { %334 = vsyncpa [#allocation6], 1 }
 0x126   :  { %336 = vsyncpa [#allocation6 + $0x1], 1 }
 0x127   :  { %337 = vsyncpa [#allocation7], 1 }
 0x128   :  { %339 = vsyncpa [#allocation7 + $0x1], 1 }
 0x129   :  { %340 = vsyncpa [#allocation8], 1 }
 0x12a   :  { %342 = vsyncpa [#allocation8 + $0x1], 1 }

</bundles_post_ra>
